<compile_context>
chip_gen: v5e
topology: v5e:2x2
jax: 0.10.0
libtpu: 0.0.40
codegen_flags: <defaults>
</compile_context>

<pallas_src>
import functools

import jax
import jax.numpy as jnp
from jax.experimental import pallas as pl
from jax.experimental.pallas import tpu as pltpu

_LANES = 128


def _rmsle_kernel(pred_ref, actual_ref, out_ref, acc_ref, *, total_elems):
    i = pl.program_id(0)

    @pl.when(i == 0)
    def _():
        acc_ref[...] = jnp.zeros_like(acc_ref)

    # Hot path: load native dtype, cast in-register, log1p, squared difference.
    p = pred_ref[...].astype(jnp.float32)
    a = actual_ref[...].astype(jnp.float32)
    d = jnp.log1p(p) - jnp.log1p(a)
    sq = d * d  # (tile_rows, 128)

    # VPU-only partial reduction into an (8, 128) vreg-shaped accumulator;
    # the reshape stays within (8,128) tile boundaries (no layout copy).
    tr = sq.shape[0]
    acc_ref[...] += jnp.sum(sq.reshape(tr // 8, 8, _LANES), axis=0)

    # Single cross-lane/sublane reduce + sqrt, once at the end.
    @pl.when(i == pl.num_programs(0) - 1)
    def _():
        out_ref[0, 0] = jnp.sqrt(jnp.sum(acc_ref[...]) / jnp.float32(total_elems))


def rmsle_loss(pred, actual, *, tile_rows=2048):
    """sqrt(mean((log(pred+1) - log(actual+1))**2)) over all elements, via Pallas."""
    assert pred.shape == actual.shape, "pred/actual must have the same shape"

    n = int(pred.size)
    assert n > 0

    # Choose a tile height: multiple of 8, capped for small inputs.
    rows_needed = pl.cdiv(n, _LANES)
    tr = min(int(tile_rows), max(8, ((rows_needed + 7) // 8) * 8))
    assert tr % 8 == 0
    rows_padded = ((rows_needed + tr - 1) // tr) * tr
    padded = rows_padded * _LANES

    p = jnp.reshape(pred, (-1,))
    a = jnp.reshape(actual, (-1,))
    if padded != n:
        # Zero-pad BOTH inputs: padded elements give d = log1p(0)-log1p(0) = 0,
        # so they add nothing to the sum; mean uses the true element count.
        p = jnp.pad(p, (0, padded - n))
        a = jnp.pad(a, (0, padded - n))
    p = p.reshape(rows_padded, _LANES)
    a = a.reshape(rows_padded, _LANES)

    grid = (rows_padded // tr,)
    kernel = functools.partial(_rmsle_kernel, total_elems=n)

    out = pl.pallas_call(
        kernel,
        out_shape=jax.ShapeDtypeStruct((1, 1), jnp.float32),
        grid_spec=pltpu.PrefetchScalarGridSpec(
            num_scalar_prefetch=0,
            grid=grid,
            in_specs=[
                pl.BlockSpec((tr, _LANES), lambda i: (i, 0)),
                pl.BlockSpec((tr, _LANES), lambda i: (i, 0)),
            ],
            out_specs=pl.BlockSpec(
                (1, 1), lambda i: (0, 0), memory_space=pltpu.SMEM
            ),
            scratch_shapes=[pltpu.VMEM((8, _LANES), jnp.float32)],
        ),
        compiler_params=pltpu.CompilerParams(
            dimension_semantics=("arbitrary",),  # sequential reduction axis
            vmem_limit_bytes=64 * 1024 * 1024,   # headroom for large tiles (v5e default is 16 MiB)
        ),
    )(p, a)
    return out[0, 0]


def rmsle_loss_ref(pred, actual):
    p = pred.astype(jnp.float32)
    a = actual.astype(jnp.float32)
    d = jnp.log1p(p) - jnp.log1p(a)
    return jnp.sqrt(jnp.mean(d * d))


if __name__ == "__main__":
    key = jax.random.PRNGKey(0)
    kp, ka, kp2, ka2 = jax.random.split(key, 4)

    # Case 1: small, tile-friendly 2-D shape (house-price-like positive values).
    pred1 = jax.random.uniform(kp, (16, 128), dtype=jnp.float32, minval=0.1, maxval=10.0)
    act1 = jax.random.uniform(ka, (16, 128), dtype=jnp.float32, minval=0.1, maxval=10.0)
    out1 = jax.block_until_ready(rmsle_loss(pred1, act1))
    ref1 = jax.block_until_ready(rmsle_loss_ref(pred1, act1))
    assert jnp.allclose(out1, ref1, rtol=1e-5, atol=1e-6), (out1, ref1)

    # Case 2: awkward shape (exercises flatten + zero-pad + mean over true count).
    pred2 = jax.random.uniform(kp2, (7, 33), dtype=jnp.float32, minval=0.1, maxval=10.0)
    act2 = jax.random.uniform(ka2, (7, 33), dtype=jnp.float32, minval=0.1, maxval=10.0)
    out2 = jax.block_until_ready(rmsle_loss(pred2, act2))
    ref2 = jax.block_until_ready(rmsle_loss_ref(pred2, act2))
    assert jnp.allclose(out2, ref2, rtol=1e-5, atol=1e-6), (out2, ref2)

    print("KERNEL_OK")
</pallas_src>

<mosaic_0001>
module attributes {stable_mosaic.version = 11 : i64} {
  func.func @_rmsle_kernel(%arg0: i32, %arg1: memref<16x128xf32, #tpu.memory_space<vmem>>, %arg2: memref<16x128xf32, #tpu.memory_space<vmem>>, %arg3: memref<1x1xf32, #tpu.memory_space<smem>>, %arg4: memref<8x128xf32, #tpu.memory_space<vmem>>) attributes {dimension_semantics = [#tpu.dimension_semantics<arbitrary>], iteration_bounds = array<i64: 1>, scalar_prefetch = 0 : i64, scratch_operands = 1 : i64, tpu.core_type = #tpu.core_type<tc>, window_params = [{transform_indices = @transform_0, window_bounds = array<i64: 16, 128>}, {transform_indices = @transform_1, window_bounds = array<i64: 16, 128>}, {transform_indices = @transform_2, window_bounds = array<i64: 1, 1>}]} {
    %c0_i32 = arith.constant 0 : i32
    %0 = arith.cmpi eq, %arg0, %c0_i32 : i32
    %1 = arith.extui %0 : i1 to i32
    %c0_i32_0 = arith.constant 0 : i32
    %2 = arith.cmpi ne, %1, %c0_i32_0 : i32
    scf.if %2 {
      %cst_10 = arith.constant 0.000000e+00 : f32
      %17 = vector.broadcast %cst_10 : f32 to vector<8x128xf32>
      %c0_11 = arith.constant 0 : index
      %c0_12 = arith.constant 0 : index
      %18 = vector.load %arg4[%c0_11, %c0_12] : memref<8x128xf32, #tpu.memory_space<vmem>>, vector<8x128xf32>
      tpu.vector_store %arg4[%c0_11, %c0_12], %17 {strides = array<i32>} : memref<8x128xf32, #tpu.memory_space<vmem>>, vector<8x128xf32>,
    } else {
    }
    %c0 = arith.constant 0 : index
    %c0_1 = arith.constant 0 : index
    %3 = vector.load %arg1[%c0, %c0_1] : memref<16x128xf32, #tpu.memory_space<vmem>>, vector<16x128xf32>
    %c0_2 = arith.constant 0 : index
    %c0_3 = arith.constant 0 : index
    %4 = vector.load %arg2[%c0_2, %c0_3] : memref<16x128xf32, #tpu.memory_space<vmem>>, vector<16x128xf32>
    %5 = math.log1p %3 : vector<16x128xf32>
    %6 = math.log1p %4 : vector<16x128xf32>
    %7 = arith.subf %5, %6 : vector<16x128xf32>
    %8 = arith.mulf %7, %7 : vector<16x128xf32>
    %c0_4 = arith.constant 0 : index
    %c0_5 = arith.constant 0 : index
    %9 = vector.load %arg4[%c0_4, %c0_5] : memref<8x128xf32, #tpu.memory_space<vmem>>, vector<8x128xf32>
    %10 = vector.shape_cast %8 : vector<16x128xf32> to vector<2x8x128xf32>
    %cst = arith.constant dense<0.000000e+00> : vector<8x128xf32>
    %11 = vector.multi_reduction <add>, %10, %cst [0] : vector<2x8x128xf32> to vector<8x128xf32>
    %12 = arith.addf %9, %11 : vector<8x128xf32>
    %c0_6 = arith.constant 0 : index
    %c0_7 = arith.constant 0 : index
    %13 = vector.load %arg4[%c0_6, %c0_7] : memref<8x128xf32, #tpu.memory_space<vmem>>, vector<8x128xf32>
    tpu.vector_store %arg4[%c0_6, %c0_7], %12 {strides = array<i32>} : memref<8x128xf32, #tpu.memory_space<vmem>>, vector<8x128xf32>,
    %c0_i32_8 = arith.constant 0 : i32
    %14 = arith.cmpi eq, %arg0, %c0_i32_8 : i32
    %15 = arith.extui %14 : i1 to i32
    %c0_i32_9 = arith.constant 0 : i32
    %16 = arith.cmpi ne, %15, %c0_i32_9 : i32
    scf.if %16 {
      %c0_10 = arith.constant 0 : index
      %c0_11 = arith.constant 0 : index
      %17 = vector.load %arg4[%c0_10, %c0_11] : memref<8x128xf32, #tpu.memory_space<vmem>>, vector<8x128xf32>
      %18 = vector.shape_cast %17 : vector<8x128xf32> to vector<1x8x128xf32>
      %cst_12 = arith.constant dense<0.000000e+00> : vector<1xf32>
      %19 = vector.multi_reduction <add>, %18, %cst_12 [1, 2] : vector<1x8x128xf32> to vector<1xf32>
      %20 = vector.shape_cast %19 : vector<1xf32> to vector<1x1x1xf32>
      %21 = vector.extract %20[0, 0, 0] : f32 from vector<1x1x1xf32>
      %cst_13 = arith.constant 2.048000e+03 : f32
      %22 = arith.divf %21, %cst_13 : f32
      %23 = math.sqrt %22 : f32
      %c0_14 = arith.constant 0 : index
      %c0_15 = arith.constant 0 : index
      %24 = memref.load %arg3[%c0_14, %c0_15] : memref<1x1xf32, #tpu.memory_space<smem>>
      memref.store %23, %arg3[%c0_14, %c0_15] : memref<1x1xf32, #tpu.memory_space<smem>>
    } else {
    }
    return
  }
  func.func @transform_0(%arg0: i32) -> (i32, i32) {
    %c0_i32 = arith.constant 0 : i32
    %c0_i32_0 = arith.constant 0 : i32
    return %arg0, %c0_i32 : i32, i32
  }
  func.func @transform_1(%arg0: i32) -> (i32, i32) {
    %c0_i32 = arith.constant 0 : i32
    %c0_i32_0 = arith.constant 0 : i32
    return %arg0, %c0_i32 : i32, i32
  }
  func.func @transform_2(%arg0: i32) -> (i32, i32) {
    %c0_i32 = arith.constant 0 : i32
    %c0_i32_0 = arith.constant 0 : i32
    %c0_i32_1 = arith.constant 0 : i32
    return %c0_i32, %c0_i32_0 : i32, i32
  }
}

</mosaic_0001>

<bundles_post_ra>
// kernel: tpu_custom_call.1
= control target key start
LH: loop header
LB: loop body
LE: loop exit
PB: predicated region body
PF: predicated region fallthrough
CT: control target
= control target key end

     0   :  { %7 = vsyncpa [#allocation4], 0  ;;  %s278_s0 = inlined_call_operand.hbm [shape: f32[16,128], index: 0, kind: input, shape index: {}]   ;;  %s279_s1 = inlined_call_operand.hbm [shape: f32[16,128], index: 1, kind: input, shape index: {}]   ;;  %s280_s2 = inlined_call_operand.hbm [shape: f32[1,1], index: 2, kind: output, shape index: {}]  }
   0x1   :  { %8 = vsyncpa [#allocation7], 0 }
   0x2   :  { %9 = vsyncpa [#allocation5], 0  ;;  %s14_s11 = sshll.u32 %s278_s0, 4  ;;  %s242_s12 = smov [#allocation3]   ;;  %s15_s11 = int_to_ptr.hbm [resolvable:$true] %s14_s11 }
   0x3   :  { %s16_s13 = sshll.u32 %s242_s12, 4  ;;  %s27_s16 = sshll.u32 %s279_s1, 4  ;;  %s17_s13 = int_to_ptr.vmem [resolvable:$true] %s16_s13  ;;  %s28_s16 = int_to_ptr.hbm [resolvable:$true] %s27_s16 }
   0x4   :  { %s243_s17 = smov 128   ;;  %s244_s18 = smov 8  }
   0x5   :  { %22 = dma.hbm_to_vmem [thread:$0]  %s15_s11, 256, %s17_s13, [#allocation4], %s243_s17, %s243_s17, %s244_s18  }
   0x6   :  { %s245_s19 = smov [#allocation6]  }
   0x7   :  { %s29_s20 = sshll.u32 %s245_s19, 4  ;;  %s30_s20 = int_to_ptr.vmem [resolvable:$true] %s29_s20 }
   0x8   :  { %35 = dma.hbm_to_vmem [thread:$0]  %s28_s16, 256, %s30_s20, [#allocation7], %s243_s17, %s243_s17, %s244_s18  }
   0x9   :  { %236 = dma.done.wait [#allocation4], 256  }
   0xa   :  { %237 = vsyncadd [#allocation4], 4294967040 }
   0xb   :  { %238 = dma.done.wait [#allocation7], 256  }
   0xc   :  { %239 = vsyncadd [#allocation7], 4294967040  ;;  %v49_v0 = vld [vmem:[#allocation3] sm:$0xff]  ;;  %v50_v1 = vld [vmem:[#allocation3 + $0x8] sm:$0xff]  ;;  %v246_v42 = vmov 2048.0   ;;  %s140_s24 = sshll.u32 %s280_s2, 4  ;;  %s141_s24 = int_to_ptr.hbm [resolvable:$true] %s140_s24 }
   0xd   :  { %v51_v2 = vld [vmem:[#allocation6] sm:$0xff]  ;;  %v53_v3 = vadd.f32 1.0, %v49_v0  ;;  %v56_v4 = vmul.f32 -0.5, %v49_v0  ;;  %v62_v5 = vadd.f32 1.0, %v50_v1  ;;  %v52_v6 = vld [vmem:[#allocation6 + $0x8] sm:$0xff]  ;;  %v65_v7 = vmul.f32 -0.5, %v50_v1 }
   0xe   :  { %v71_v8 = vadd.f32 1.0, %v51_v2  ;;  %v74_v9 = vmul.f32 -0.5, %v51_v2  ;;  %v59_v11 = vand.u32 2147483647, %v49_v0  ;;  %v80_v12 = vadd.f32 1.0, %v52_v6  ;;  %s247_s26 = smov [#allocation8]  }
   0xf   :  { %164 = vlog2.f32 %v53_v3  ;;  %v57_v10 = vadd.f32 1.0, %v56_v4  ;;  %v66_v13 = vadd.f32 1.0, %v65_v7  ;;  %v83_v15 = vmul.f32 -0.5, %v52_v6 }
  0x10   :  { %166 = vlog2.f32 %v62_v5  ;;  %v75_v14 = vadd.f32 1.0, %v74_v9  ;;  %v68_v16 = vand.u32 2147483647, %v50_v1  ;;  %v77_v17 = vand.u32 2147483647, %v51_v2 }
  0x11   :  { %168 = vlog2.f32 %v71_v8  ;;  %v58_v18 = vmul.f32 %v57_v10, %v49_v0  ;;  %v84_v19 = vadd.f32 1.0, %v83_v15  ;;  %vm269_vm0 = vcmp.lt.f32.partialorder %v59_v11, 0.0004427343 }
  0x12   :  { %170 = vlog2.f32 %v80_v12  ;;  %v86_v22 = vand.u32 2147483647, %v52_v6  ;;  %v67_v25 = vmul.f32 %v66_v13, %v50_v1  ;;  %v76_v26 = vmul.f32 %v75_v14, %v51_v2 }
  0x13   :  { %vm69_vm1 = vcmp.lt.f32.partialorder %v68_v16, 0.0004427343  ;;  %vm78_vm2 = vcmp.lt.f32.partialorder %v77_v17, 0.0004427343  ;;  %v85_v31 = vmul.f32 %v84_v19, %v52_v6  ;;  %172 = vrcp.f32 %v246_v42 }
  0x14   :  { %vm87_vm3 = vcmp.lt.f32.partialorder %v86_v22, 0.0004427343 }
  0x15   :  { %v165_v20 = vpop.eup %164 }
  0x16   :  { %v167_v23 = vpop.eup %166  ;;  %v55_v24 = vmul.f32 0.6931472, %v165_v20 }
  0x17   :  { %v169_v27 = vpop.eup %168  ;;  %v64_v28 = vmul.f32 0.6931472, %v167_v23 }
  0x18   :  { %v61_v29 = vsel %vm269_vm0, %v58_v18, %v55_v24  ;;  %v73_v30 = vmul.f32 0.6931472, %v169_v27  ;;  %v171_v32 = vpop.eup %170 }
  0x19   :  { %v70_v33 = vsel %vm69_vm1, %v67_v25, %v64_v28  ;;  %v82_v35 = vmul.f32 0.6931472, %v171_v32  ;;  %v173_v43 = vpop.eup %172 }
  0x1a   :  { %v79_v34 = vsel %vm78_vm2, %v76_v26, %v73_v30  ;;  %v111_v44 = vmul.f32 2048.0, %v173_v43  ;;  %vm115_vm4 = vweird.f32 %v173_v43 }
  0x1b   :  { %v89_v36 = vsub.f32 %v61_v29, %v79_v34  ;;  %v88_v37 = vsel %vm87_vm3, %v85_v31, %v82_v35 }
  0x1c   :  { %v90_v38 = vsub.f32 %v70_v33, %v88_v37  ;;  %v112_v45 = vsub.f32 1.0, %v111_v44 }
  0x1d   :  { %v91_v39 = vmul.f32 %v89_v36, %v89_v36 }
  0x1e   :  { %v92_v40 = vmul.f32 %v90_v38, %v90_v38  ;;  %v113_v49 = vmul.f32 %v173_v43, %v112_v45 }
  0x20   :  { %v94_v41 = vadd.f32 %v92_v40, %v91_v39  ;;  %v114_v52 = vadd.f32 %v173_v43, %v113_v49 }
  0x22   :  { %101 = vadd.xlane.f32.xlu0 %v94_v41  ;;  %v116_v55 = vsel %vm115_vm4, %v173_v43, %v114_v52 }
  0x95   :  { %v102_v46 = vpop.xlane.xlu0 %101 }
  0x96   :  { %v103_v47 = vrot.slane %v102_v46, 4 }
  0x98   :  { %v104_v48 = vadd.f32 %v103_v47, %v102_v46 }
  0x9a   :  { %v105_v50 = vrot.slane %v104_v48, 2 }
  0x9c   :  { %v106_v51 = vadd.f32 %v105_v50, %v104_v48 }
  0x9e   :  { %v107_v53 = vrot.slane %v106_v51, 1 }
  0xa0   :  { %v108_v54 = vadd.f32 %v107_v53, %v106_v51 }
  0xa2   :  { %152 = vpush %v108_v54 }
  0xa3   :  { %154 = vpush %v116_v55 }
  0xd3   :  { %s153_s0 = spop %152 }
  0xd4   :  { %s155_s1 = spop %154 }
  0xd5   :  { %s118_s21 = smul.f32 %s155_s1, %s153_s0 }
  0xd7   :  { %v119_v56 = vstv %s118_s21 }
  0xd8   :  { %174 = vrsqrt.f32 %v119_v56  ;;  %vm127_vm5 = vcmp.eq.f32.partialorder %v119_v56, inf  ;;  %v130_v0 = vand.u32 2147483648, %v119_v56  ;;  %vm129_vm6 = vcmp.eq.f32.partialorder %v119_v56, 0.0 }
  0xde   :  { %v175_v57 = vpop.eup %174 }
  0xdf   :  { %v121_v58 = vmul.f32 %v175_v57, %v119_v56 }
  0xe1   :  { %v122_v59 = vmul.f32 %v175_v57, %v121_v58 }
  0xe3   :  { %v123_v60 = vmul.f32 0.5, %v122_v59 }
  0xe5   :  { %v124_v61 = vsub.f32 1.5, %v123_v60 }
  0xe7   :  { %v125_v62 = vmul.f32 %v175_v57, %v124_v61 }
  0xe9   :  { %v126_v63 = vmul.f32 %v125_v62, %v119_v56 }
  0xeb   :  { %v128_v1 = vsel %vm127_vm5, %v119_v56, %v126_v63 }
  0xec   :  { %v131_v2 = vsel %vm129_vm6, %v130_v0, %v128_v1 }
  0xed   :  { %156 = vpush %v131_v2 }
 0x11e   :  { %s157_s25 = spop %156 }
 0x11f   :  { %134 = sst [smem:[#allocation8]] %s157_s25 }
 0x120   :  { %143 = dma.smem_to_hbm %s247_s26, 16, %s141_s24, [#allocation5]  }
 0x121   :  { %240 = dma.done.wait [#allocation5], 16  }
 0x122   :  { %241 = vsyncadd [#allocation5], 4294967280 }
 0x123   :  { %148 = sfence }
 0x124   :  { %149 = vsyncpa [#allocation4], 1 }
 0x125   :  { %150 = vsyncpa [#allocation7], 1 }
 0x126   :  { %151 = vsyncpa [#allocation5], 1 }

</bundles_post_ra>
